<compile_context>
chip_gen: v7x
topology: tpu7x:2x2x1
jax: 0.10.0
libtpu: 0.0.40
codegen_flags: <defaults>
</compile_context>

<pallas_src>
import functools

import jax
import jax.numpy as jnp
from jax import lax
from jax.experimental import pallas as pl
from jax.experimental.pallas import tpu as pltpu


def _cdiv(a, b):
    return -(-a // b)


def _round_up(a, b):
    return _cdiv(a, b) * b


# ---------------------------------------------------------------------------
# Device-aware sizing.
# ---------------------------------------------------------------------------
def _tpu_vmem_capacity_bytes():
    """Best-effort physical VMEM capacity; conservative (v7x, 64 MiB) fallback."""
    try:
        info = pltpu.get_tpu_info()
        cap = getattr(info, "vmem_capacity_bytes", None)
        if cap:
            return int(cap)
    except Exception:
        pass
    try:
        kind = jax.devices()[0].device_kind.lower()
        if "v7" in kind or "7x" in kind:
            return 64 * 1024 * 1024
        if "v2" in kind or "v3" in kind:
            return 16 * 1024 * 1024
        if any(t in kind for t in ("v4", "v5", "v6")):
            return 128 * 1024 * 1024
    except Exception:
        pass
    return 64 * 1024 * 1024


def _pick_tile(hw, itemsize, bt, c, max_block_bytes):
    """Lane tile + block count for one (bt, c, hw) stream under a VMEM byte budget.

    Returns (tile, kt) with either tile == hw (single block) or tile % 128 == 0.
    The budget accounts for sublane/lane padding of the VMEM block layout.
    """
    sub = 8 * max(1, 4 // max(1, itemsize))          # f32: 8, bf16: 16, int8/fp8: 32
    row_bytes = bt * _round_up(c, sub) * itemsize    # bytes per lane, padding included
    if _round_up(hw, 128) * row_bytes <= max_block_bytes or hw <= 128:
        return hw, 1                                 # single full, unmasked block
    lanes = max(128, (max_block_bytes // row_bytes) // 128 * 128)
    if lanes >= hw:
        return hw, 1
    kt = _cdiv(hw, lanes)
    tile = min(lanes, _round_up(_cdiv(hw, kt), 128))  # even-ish blocks, still <= budget
    return tile, _cdiv(hw, tile)


def _pick_batch_tile(B):
    """Largest divisor of B that is <= min(8, B // 2): amortizes the finalize while
    keeping >= 2 parallel batch steps for megacore sharding."""
    if B <= 1:
        return 1
    cap = max(1, min(8, B // 2))
    for bt in range(cap, 0, -1):
        if B % bt == 0:
            return bt
    return 1


# ---------------------------------------------------------------------------
# In-kernel pooling helpers.
# ---------------------------------------------------------------------------
def _fold_chunk(acc_ref, data_ref, c0, cc, tile, valid):
    """acc_ref[:, c0:c0+cc, :] += data_ref[:, c0:c0+cc, :tile] folded onto 128 lanes (f32).

    `valid` (python int or None): if set, lanes >= valid of this tile are masked out.
    It is only non-None on a tensor's final, partially-filled spatial block, so the
    steady state emits no iota/compare/select at all.
    """
    bt = acc_ref.shape[0]
    nfull = tile // 128
    rem = tile - nfull * 128

    def chunk(off):
        blk = data_ref[:, c0:c0 + cc, pl.ds(off, 128)].astype(jnp.float32)
        if valid is not None:
            lane = jax.lax.broadcasted_iota(jnp.int32, (bt, cc, 128), 2) + off
            blk = jnp.where(lane < valid, blk, 0.0)
        return blk

    if nfull == 0:
        acc = jnp.zeros((bt, cc, 128), jnp.float32)
    elif nfull <= 8:
        acc = chunk(0)
        for j in range(1, nfull):
            acc = acc + chunk(j * 128)
    else:
        # Bounded live ranges regardless of tile size; unroll keeps the LLO scheduler busy.
        unroll = 8 if nfull % 8 == 0 else (4 if nfull % 4 == 0 else (2 if nfull % 2 == 0 else 1))

        def body(j, a):
            return a + chunk(pl.multiple_of(j * 128, 128))

        acc = lax.fori_loop(0, nfull, body,
                            jnp.zeros((bt, cc, 128), jnp.float32), unroll=unroll)

    if rem:  # only for a single, un-split block whose width is not lane-aligned
        tail = data_ref[:, c0:c0 + cc, nfull * 128: tile].astype(jnp.float32)
        if valid is not None:
            lane = jax.lax.broadcasted_iota(jnp.int32, (bt, cc, rem), 2) + nfull * 128
            tail = jnp.where(lane < valid, tail, 0.0)
        s = jnp.sum(tail, axis=-1, keepdims=True)                  # (bt, cc, 1)
        lane0 = jax.lax.broadcasted_iota(jnp.int32, (bt, cc, 128), 2)
        acc = acc + jnp.where(lane0 == 0, s, 0.0)

    acc_ref[:, c0:c0 + cc, :] += acc


def _fold_block(acc_ref, data_ref, tile, c_chunk, valid):
    """Fold the whole (Bt, C, tile) block, chunked along C to bound vreg pressure."""
    c_total = acc_ref.shape[1]
    for c0 in range(0, c_total, c_chunk):
        _fold_chunk(acc_ref, data_ref, c0, min(c_chunk, c_total - c0), tile, valid)


def _accumulate(acc_ref, data_ref, k, hw, kt, tile, k_grid, c_chunk):
    """One grid step's contribution of `data_ref` to the running spatial sum."""
    full_tail = (tile * kt == hw)

    def _steady():
        _fold_block(acc_ref, data_ref, tile, c_chunk, None)

    def _tail():
        _fold_block(acc_ref, data_ref, tile, c_chunk, hw - (kt - 1) * tile)

    if full_tail:
        if kt == k_grid:
            _steady()                        # every step real, never masked
        else:
            pl.when(k < kt)(_steady)         # skip this tensor's dead (clamped) steps
    else:
        if kt > 1:
            pl.when(k < kt - 1)(_steady)     # unmasked steady state
        pl.when(k == kt - 1)(_tail)          # masked, only on the final partial block


def _accumulate_split(acc_ref, data_ref, s, k, hw, kt, ksub, tile, c_chunk):
    """Split-reduction variant: split `s` owns global spatial blocks [s*ksub, (s+1)*ksub)."""
    full_tail = (tile * kt == hw)
    g = s * ksub + k
    active = jnp.logical_and(k < ksub, g < kt)

    def _steady():
        _fold_block(acc_ref, data_ref, tile, c_chunk, None)

    def _tail():
        _fold_block(acc_ref, data_ref, tile, c_chunk, hw - (kt - 1) * tile)

    if full_tail:
        pl.when(active)(_steady)
    else:
        pl.when(jnp.logical_and(active, g < kt - 1))(_steady)
        pl.when(jnp.logical_and(active, g == kt - 1))(_tail)


def _stable_sigmoid(z):
    ez = jnp.exp(-jnp.abs(z))
    return jnp.where(z >= 0.0, 1.0, ez) / (1.0 + ez)


# ---------------------------------------------------------------------------
# Kernels.
# ---------------------------------------------------------------------------
def _secat_kernel(x_ref, e_ref, w1a_ref, w1b_ref, w2t_ref, b2_ref,
                  gate_ref, acc_x_ref, acc_e_ref, *,
                  hw_x, hw_e, kx, ke, tile_x, tile_e, k_grid, c_chunk):
    """Fused path: pool both tensors, run the SE MLP once per batch tile."""
    k = pl.program_id(1)

    @pl.when(k == 0)
    def _init():
        acc_x_ref[...] = jnp.zeros_like(acc_x_ref)
        acc_e_ref[...] = jnp.zeros_like(acc_e_ref)

    _accumulate(acc_x_ref, x_ref, k, hw_x, kx, tile_x, k_grid, c_chunk)
    _accumulate(acc_e_ref, e_ref, k, hw_e, ke, tile_e, k_grid, c_chunk)

    @pl.when(k == k_grid - 1)
    def _finalize():
        # One small cross-lane reduce per tensor, then the true mean.
        x_pool = jnp.sum(acc_x_ref[...], axis=-1) * (1.0 / hw_x)       # (Bt, C) f32
        e_pool = jnp.sum(acc_e_ref[...], axis=-1) * (1.0 / hw_e)

        # Linear(2C -> out_ch, no bias) on the concat == split matmul; native-dtype
        # weights on the MXU (only the tiny pooled vectors are cast), then ReLU.
        wd = w1a_ref.dtype
        h = (jnp.dot(x_pool.astype(wd), w1a_ref[...], preferred_element_type=jnp.float32)
             + jnp.dot(e_pool.astype(wd), w1b_ref[...], preferred_element_type=jnp.float32))
        h = jnp.maximum(h, 0.0)

        # Linear(out_ch -> C, bias) + Sigmoid.
        z = (jnp.dot(h.astype(w2t_ref.dtype), w2t_ref[...],
                     preferred_element_type=jnp.float32)
             + b2_ref[...].astype(jnp.float32))
        gate_ref[...] = _stable_sigmoid(z)[:, None, :].astype(gate_ref.dtype)


def _secat_pool_split_kernel(x_ref, e_ref, sx_ref, se_ref, acc_x_ref, acc_e_ref, *,
                             hw_x, hw_e, kx, ke, ksub_x, ksub_e,
                             tile_x, tile_e, k_grid, c_chunk):
    """B == 1 megacore path: each parallel split produces partial pooled *sums*."""
    s = pl.program_id(0)
    k = pl.program_id(1)

    @pl.when(k == 0)
    def _init():
        acc_x_ref[...] = jnp.zeros_like(acc_x_ref)
        acc_e_ref[...] = jnp.zeros_like(acc_e_ref)

    _accumulate_split(acc_x_ref, x_ref, s, k, hw_x, kx, ksub_x, tile_x, c_chunk)
    _accumulate_split(acc_e_ref, e_ref, s, k, hw_e, ke, ksub_e, tile_e, c_chunk)

    @pl.when(k == k_grid - 1)
    def _finalize():
        sx_ref[...] = jnp.sum(acc_x_ref[...], axis=-1)[:, None, :]     # (1, 1, C) f32
        se_ref[...] = jnp.sum(acc_e_ref[...], axis=-1)[:, None, :]


# ---------------------------------------------------------------------------
# pallas_call builders.
# ---------------------------------------------------------------------------
def _spatial_index_map(kt, k_grid):
    if kt == k_grid:
        return lambda b, k: (b, 0, k)
    if kt == 1:
        return lambda b, k: (b, 0, 0)
    # Fewer blocks than grid steps: clamp so we never DMA out of bounds; the kernel
    # skips those steps (consecutive identical indices are not re-fetched).
    return lambda b, k: (b, 0, jnp.minimum(k, kt - 1))


def _split_index_map(kt, ksub):
    if kt == 1:
        return lambda s, k: (0, 0, 0)
    return lambda s, k: (0, 0, jnp.minimum(s * ksub + k, kt - 1))


def _secat_gate_fused(x_flat, e_flat, w1a, w1b, w2t, b2_2d, *,
                      hw_x, hw_e, kx, ke, tile_x, tile_e, k_grid,
                      bt, nb, c_chunk, params):
    B, C, _ = x_flat.shape
    out_ch = w1a.shape[1]

    kernel = functools.partial(
        _secat_kernel, hw_x=hw_x, hw_e=hw_e, kx=kx, ke=ke,
        tile_x=tile_x, tile_e=tile_e, k_grid=k_grid, c_chunk=c_chunk)

    gate = pl.pallas_call(
        kernel,
        out_shape=jax.ShapeDtypeStruct((B, 1, C), x_flat.dtype),
        grid_spec=pltpu.PrefetchScalarGridSpec(
            num_scalar_prefetch=0,
            grid=(nb, k_grid),                         # batch tiles parallel, reduction last
            in_specs=[
                pl.BlockSpec((bt, C, tile_x), _spatial_index_map(kx, k_grid)),
                pl.BlockSpec((bt, C, tile_e), _spatial_index_map(ke, k_grid)),
                pl.BlockSpec((C, out_ch), lambda b, k: (0, 0)),   # VMEM-resident weights
                pl.BlockSpec((C, out_ch), lambda b, k: (0, 0)),
                pl.BlockSpec((out_ch, C), lambda b, k: (0, 0)),
                pl.BlockSpec((1, C), lambda b, k: (0, 0)),
            ],
            out_specs=pl.BlockSpec((bt, 1, C), lambda b, k: (b, 0, 0)),
            scratch_shapes=[
                pltpu.VMEM((bt, C, 128), jnp.float32),   # folded partial sum of x
                pltpu.VMEM((bt, C, 128), jnp.float32),   # folded partial sum of extractor
            ],
        ),
        compiler_params=params,
    )(x_flat, e_flat, w1a, w1b, w2t, b2_2d)
    return gate.reshape(B, C)


def _secat_gate_split(x_flat, e_flat, w1a, w1b, w2t, b2_2d, *,
                      hw_x, hw_e, kx, ke, tile_x, tile_e, c_chunk, params,
                      n_split=2):
    _, C, _ = x_flat.shape
    ksub_x = _cdiv(kx, n_split)
    ksub_e = _cdiv(ke, n_split)
    k_grid = max(ksub_x, ksub_e)

    kernel = functools.partial(
        _secat_pool_split_kernel, hw_x=hw_x, hw_e=hw_e, kx=kx, ke=ke,
        ksub_x=ksub_x, ksub_e=ksub_e, tile_x=tile_x, tile_e=tile_e,
        k_grid=k_grid, c_chunk=c_chunk)

    psum_x, psum_e = pl.pallas_call(
        kernel,
        out_shape=(jax.ShapeDtypeStruct((n_split, 1, C), jnp.float32),
                   jax.ShapeDtypeStruct((n_split, 1, C), jnp.float32)),
        grid_spec=pltpu.PrefetchScalarGridSpec(
            num_scalar_prefetch=0,
            grid=(n_split, k_grid),                    # splits parallel (both v7x cores)
            in_specs=[
                pl.BlockSpec((1, C, tile_x), _split_index_map(kx, ksub_x)),
                pl.BlockSpec((1, C, tile_e), _split_index_map(ke, ksub_e)),
            ],
            out_specs=(pl.BlockSpec((1, 1, C), lambda s, k: (s, 0, 0)),
                       pl.BlockSpec((1, 1, C), lambda s, k: (s, 0, 0))),
            scratch_shapes=[
                pltpu.VMEM((1, C, 128), jnp.float32),
                pltpu.VMEM((1, C, 128), jnp.float32),
            ],
        ),
        compiler_params=params,
    )(x_flat, e_flat)

    # Tiny (1, C) tail in plain XLA: combine splits, SE MLP, sigmoid.
    x_pool = jnp.sum(psum_x[:, 0, :], axis=0, keepdims=True) * (1.0 / hw_x)
    e_pool = jnp.sum(psum_e[:, 0, :], axis=0, keepdims=True) * (1.0 / hw_e)
    h = jnp.maximum(x_pool @ w1a.astype(jnp.float32) + e_pool @ w1b.astype(jnp.float32), 0.0)
    z = h @ w2t.astype(jnp.float32) + b2_2d.astype(jnp.float32)
    return jax.nn.sigmoid(z)                           # (1, C) f32


# ---------------------------------------------------------------------------
# Public forward.
# ---------------------------------------------------------------------------
def secat_forward(x, extractor, w1, w2, b2, *,
                  max_block_bytes=None, vmem_limit_bytes=None, batch_tile=None):
    """x: (B, C, H, W); extractor: (B, C, He, We).
    w1: (out_ch, 2*C) torch Linear layout; w2: (C, out_ch); b2: (C,)."""
    B, C, H, W = x.shape
    Be, Ce, He, We = extractor.shape
    assert Be == B and Ce == C
    out_ch = w1.shape[0]
    assert w1.shape == (out_ch, 2 * C) and w2.shape == (C, out_ch) and b2.shape == (C,)
    hw_x, hw_e = H * W, He * We

    # Device-aware budgets: large blocks on 128 MiB-VMEM chips (v4/v5e/v6e), VMEM-safe
    # blocks on v7x's 64 MiB; vmem limit raised above the scoped default either way.
    vmem_cap = _tpu_vmem_capacity_bytes()
    if max_block_bytes is None:
        max_block_bytes = (16 << 20) if vmem_cap >= (128 << 20) else max(2 << 20, vmem_cap // 10)
    if vmem_limit_bytes is None:
        vmem_limit_bytes = min(vmem_cap * 3 // 4, 100 << 20)

    x_flat = x.reshape(B, C, hw_x)
    e_flat = extractor.reshape(B, C, hw_e)

    # Torch-layout weight glue (tiny, once): W1^T = [W1a; W1b] splits the concat matmul.
    w1t = jnp.transpose(w1)                            # (2C, out_ch)
    w1a, w1b = w1t[:C, :], w1t[C:, :]
    w2t = jnp.transpose(w2)                            # (out_ch, C)
    b2_2d = b2.reshape(1, C)

    bt = batch_tile if batch_tile is not None else _pick_batch_tile(B)
    if bt < 1 or B % bt != 0:
        bt = _pick_batch_tile(B)
    nb = B // bt

    tile_x, kx = _pick_tile(hw_x, x_flat.dtype.itemsize, bt, C, max_block_bytes)
    tile_e, ke = _pick_tile(hw_e, e_flat.dtype.itemsize, bt, C, max_block_bytes)
    k_grid = max(kx, ke)
    c_chunk = min(C, max(8, 64 // bt))     # fold's in-vreg accumulator stays ~<= 8 vregs

    params = pltpu.CompilerParams(
        dimension_semantics=("parallel", "arbitrary"),
        vmem_limit_bytes=int(vmem_limit_bytes),
    )

    if B == 1 and k_grid > 1:
        # Megacore path for a single batch row: split the spatial reduction 2-ways so
        # both v7x TensorCores stream HBM (harmless on single-core chips).
        gate = _secat_gate_split(x_flat, e_flat, w1a, w1b, w2t, b2_2d,
                                 hw_x=hw_x, hw_e=hw_e, kx=kx, ke=ke,
                                 tile_x=tile_x, tile_e=tile_e,
                                 c_chunk=c_chunk, params=params)
    else:
        gate = _secat_gate_fused(x_flat, e_flat, w1a, w1b, w2t, b2_2d,
                                 hw_x=hw_x, hw_e=hw_e, kx=kx, ke=ke,
                                 tile_x=tile_x, tile_e=tile_e, k_grid=k_grid,
                                 bt=bt, nb=nb, c_chunk=c_chunk, params=params)

    # expand_as(x): free/fusable XLA broadcast; the kernel never streams an HxW output.
    return jnp.broadcast_to(gate.astype(x.dtype)[:, :, None, None], x.shape)


def secat_reference(x, extractor, w1, w2, b2):
    """Pure-JAX reference mirroring the PyTorch forward (f32 math)."""
    x_pool = jnp.mean(x.astype(jnp.float32), axis=(2, 3))
    e_pool = jnp.mean(extractor.astype(jnp.float32), axis=(2, 3))
    cat = jnp.concatenate([x_pool, e_pool], axis=1)
    h = jnp.maximum(cat @ w1.astype(jnp.float32).T, 0.0)
    gate = jax.nn.sigmoid(h @ w2.astype(jnp.float32).T + b2.astype(jnp.float32))
    return jnp.broadcast_to(gate[:, :, None, None], x.shape).astype(x.dtype)


if __name__ == "__main__":
    key = jax.random.PRNGKey(0)
    ks = jax.random.split(key, 10)

    # --- Test 1: small demo shape (fused path, single spatial block per tensor) ----
    B, C, H, W = 2, 4, 16, 16
    OUT_CH = 8
    x = jax.random.normal(ks[0], (B, C, H, W), jnp.float32)
    ext = jax.random.normal(ks[1], (B, C, H, W), jnp.float32)
    w1 = 0.1 * jax.random.normal(ks[2], (OUT_CH, 2 * C), jnp.float32)
    w2 = 0.1 * jax.random.normal(ks[3], (C, OUT_CH), jnp.float32)
    b2 = 0.1 * jax.random.normal(ks[4], (C,), jnp.float32)

    out = jax.block_until_ready(secat_forward(x, ext, w1, w2, b2))
    ref = secat_reference(x, ext, w1, w2, b2)
    assert out.shape == x.shape
    assert jnp.allclose(out, ref, atol=1e-5, rtol=1e-5), "test1 mismatch"

    # --- Test 2: B=1, mismatched spatial sizes, forced tiling (split-reduction path,
    #     clamped index maps, dead steps, masked partial tails) ---------------------
    x2 = jax.random.normal(ks[5], (1, C, 40, 40), jnp.float32)
    e2 = jax.random.normal(ks[6], (1, C, 12, 12), jnp.float32)
    out2 = jax.block_until_ready(secat_forward(x2, e2, w1, w2, b2, max_block_bytes=2048))
    ref2 = secat_reference(x2, e2, w1, w2, b2)
    assert jnp.allclose(out2, ref2, atol=1e-5, rtol=1e-5), "test2 mismatch"

    # --- Test 3: batch tiling (Bt=2), multi-block x with masked tail, extractor with
    #     fewer blocks than the grid (clamp + skip machinery) -----------------------
    C3, OUT3 = 8, 16
    x3 = jax.random.normal(ks[7], (4, C3, 24, 24), jnp.float32)
    e3 = jax.random.normal(ks[8], (4, C3, 16, 16), jnp.float32)
    w1_3 = 0.1 * jax.random.normal(ks[2], (OUT3, 2 * C3), jnp.float32)
    w2_3 = 0.1 * jax.random.normal(ks[3], (C3, OUT3), jnp.float32)
    b2_3 = 0.1 * jax.random.normal(ks[4], (C3,), jnp.float32)
    out3 = jax.block_until_ready(
        secat_forward(x3, e3, w1_3, w2_3, b2_3, max_block_bytes=4096))
    ref3 = secat_reference(x3, e3, w1_3, w2_3, b2_3)
    assert jnp.allclose(out3, ref3, atol=1e-5, rtol=1e-5), "test3 mismatch"

    # --- Test 4: larger tiles exercising the lax.fori_loop(unroll=8) fold path -----
    x5 = jax.random.normal(ks[9], (2, 8, 64, 64), jnp.float32)
    e5 = jax.random.normal(ks[6], (2, 8, 32, 32), jnp.float32)
    out5 = jax.block_until_ready(
        secat_forward(x5, e5, w1_3, w2_3, b2_3, max_block_bytes=65536))
    ref5 = secat_reference(x5, e5, w1_3, w2_3, b2_3)
    assert jnp.allclose(out5, ref5, atol=1e-5, rtol=1e-5), "test4 mismatch"

    # --- Test 5: bf16 inputs/weights (native-dtype MXU path) -----------------------
    outb = jax.block_until_ready(
        secat_forward(x.astype(jnp.bfloat16), ext.astype(jnp.bfloat16),
                      w1.astype(jnp.bfloat16), w2.astype(jnp.bfloat16),
                      b2.astype(jnp.bfloat16)))
    refb = secat_reference(x.astype(jnp.bfloat16), ext.astype(jnp.bfloat16), w1, w2, b2)
    assert outb.dtype == jnp.bfloat16
    assert jnp.allclose(outb.astype(jnp.float32), refb.astype(jnp.float32),
                        atol=2e-2, rtol=0), "test5 mismatch"

    print("KERNEL_OK")
</pallas_src>

<mosaic_0001>
module attributes {stable_mosaic.version = 11 : i64} {
  func.func @_secat_kernel(%arg0: i32, %arg1: i32, %arg2: memref<1x4x256xf32, #tpu.memory_space<vmem>>, %arg3: memref<1x4x256xf32, #tpu.memory_space<vmem>>, %arg4: memref<4x8xf32, #tpu.memory_space<vmem>>, %arg5: memref<4x8xf32, #tpu.memory_space<vmem>>, %arg6: memref<8x4xf32, #tpu.memory_space<vmem>>, %arg7: memref<1x4xf32, #tpu.memory_space<vmem>>, %arg8: memref<1x1x4xf32, #tpu.memory_space<vmem>>, %arg9: memref<1x4x128xf32, #tpu.memory_space<vmem>>, %arg10: memref<1x4x128xf32, #tpu.memory_space<vmem>>) attributes {dimension_semantics = [#tpu.dimension_semantics<parallel>, #tpu.dimension_semantics<arbitrary>], iteration_bounds = array<i64: 2, 1>, scalar_prefetch = 0 : i64, scratch_operands = 2 : i64, tpu.core_type = #tpu.core_type<tc>, window_params = [{transform_indices = @transform_0, window_bounds = array<i64: 1, 4, 256>}, {transform_indices = @transform_1, window_bounds = array<i64: 1, 4, 256>}, {pipeline_mode = #tpu.pipeline_mode<synchronous>, transform_indices = @transform_2, window_bounds = array<i64: 4, 8>}, {pipeline_mode = #tpu.pipeline_mode<synchronous>, transform_indices = @transform_3, window_bounds = array<i64: 4, 8>}, {pipeline_mode = #tpu.pipeline_mode<synchronous>, transform_indices = @transform_4, window_bounds = array<i64: 8, 4>}, {pipeline_mode = #tpu.pipeline_mode<synchronous>, transform_indices = @transform_5, window_bounds = array<i64: 1, 4>}, {transform_indices = @transform_6, window_bounds = array<i64: 1, 1, 4>}]} {
    %c0_i32 = arith.constant 0 : i32
    %0 = arith.cmpi eq, %arg1, %c0_i32 : i32
    %1 = arith.extui %0 : i1 to i32
    %c0_i32_0 = arith.constant 0 : i32
    %2 = arith.cmpi ne, %1, %c0_i32_0 : i32
    scf.if %2 {
      %cst = arith.constant 0.000000e+00 : f32
      %18 = vector.broadcast %cst : f32 to vector<1x4x128xf32>
      %c0_25 = arith.constant 0 : index
      %c0_26 = arith.constant 0 : index
      %c0_27 = arith.constant 0 : index
      %19 = vector.load %arg9[%c0_25, %c0_26, %c0_27] : memref<1x4x128xf32, #tpu.memory_space<vmem>>, vector<1x4x128xf32>
      tpu.vector_store %arg9[%c0_25, %c0_26, %c0_27], %18 {strides = array<i32>} : memref<1x4x128xf32, #tpu.memory_space<vmem>>, vector<1x4x128xf32>,
      %cst_28 = arith.constant 0.000000e+00 : f32
      %20 = vector.broadcast %cst_28 : f32 to vector<1x4x128xf32>
      %c0_29 = arith.constant 0 : index
      %c0_30 = arith.constant 0 : index
      %c0_31 = arith.constant 0 : index
      %21 = vector.load %arg10[%c0_29, %c0_30, %c0_31] : memref<1x4x128xf32, #tpu.memory_space<vmem>>, vector<1x4x128xf32>
      tpu.vector_store %arg10[%c0_29, %c0_30, %c0_31], %20 {strides = array<i32>} : memref<1x4x128xf32, #tpu.memory_space<vmem>>, vector<1x4x128xf32>,
    } else {
    }
    %c0 = arith.constant 0 : index
    %c0_1 = arith.constant 0 : index
    %c0_2 = arith.constant 0 : index
    %3 = vector.load %arg2[%c0, %c0_1, %c0_2] : memref<1x4x256xf32, #tpu.memory_space<vmem>>, vector<1x4x128xf32>
    %c0_3 = arith.constant 0 : index
    %c0_4 = arith.constant 0 : index
    %c128 = arith.constant 128 : index
    %4 = vector.load %arg2[%c0_3, %c0_4, %c128] : memref<1x4x256xf32, #tpu.memory_space<vmem>>, vector<1x4x128xf32>
    %5 = arith.addf %3, %4 : vector<1x4x128xf32>
    %c0_5 = arith.constant 0 : index
    %c0_6 = arith.constant 0 : index
    %c0_7 = arith.constant 0 : index
    %6 = vector.load %arg9[%c0_5, %c0_6, %c0_7] : memref<1x4x128xf32, #tpu.memory_space<vmem>>, vector<1x4x128xf32>
    %7 = arith.addf %6, %5 : vector<1x4x128xf32>
    %c0_8 = arith.constant 0 : index
    %c0_9 = arith.constant 0 : index
    %c0_10 = arith.constant 0 : index
    %8 = vector.load %arg9[%c0_8, %c0_9, %c0_10] : memref<1x4x128xf32, #tpu.memory_space<vmem>>, vector<1x4x128xf32>
    tpu.vector_store %arg9[%c0_8, %c0_9, %c0_10], %7 {strides = array<i32>} : memref<1x4x128xf32, #tpu.memory_space<vmem>>, vector<1x4x128xf32>,
    %c0_11 = arith.constant 0 : index
    %c0_12 = arith.constant 0 : index
    %c0_13 = arith.constant 0 : index
    %9 = vector.load %arg3[%c0_11, %c0_12, %c0_13] : memref<1x4x256xf32, #tpu.memory_space<vmem>>, vector<1x4x128xf32>
    %c0_14 = arith.constant 0 : index
    %c0_15 = arith.constant 0 : index
    %c128_16 = arith.constant 128 : index
    %10 = vector.load %arg3[%c0_14, %c0_15, %c128_16] : memref<1x4x256xf32, #tpu.memory_space<vmem>>, vector<1x4x128xf32>
    %11 = arith.addf %9, %10 : vector<1x4x128xf32>
    %c0_17 = arith.constant 0 : index
    %c0_18 = arith.constant 0 : index
    %c0_19 = arith.constant 0 : index
    %12 = vector.load %arg10[%c0_17, %c0_18, %c0_19] : memref<1x4x128xf32, #tpu.memory_space<vmem>>, vector<1x4x128xf32>
    %13 = arith.addf %12, %11 : vector<1x4x128xf32>
    %c0_20 = arith.constant 0 : index
    %c0_21 = arith.constant 0 : index
    %c0_22 = arith.constant 0 : index
    %14 = vector.load %arg10[%c0_20, %c0_21, %c0_22] : memref<1x4x128xf32, #tpu.memory_space<vmem>>, vector<1x4x128xf32>
    tpu.vector_store %arg10[%c0_20, %c0_21, %c0_22], %13 {strides = array<i32>} : memref<1x4x128xf32, #tpu.memory_space<vmem>>, vector<1x4x128xf32>,
    %c0_i32_23 = arith.constant 0 : i32
    %15 = arith.cmpi eq, %arg1, %c0_i32_23 : i32
    %16 = arith.extui %15 : i1 to i32
    %c0_i32_24 = arith.constant 0 : i32
    %17 = arith.cmpi ne, %16, %c0_i32_24 : i32
    scf.if %17 {
      %c0_25 = arith.constant 0 : index
      %c0_26 = arith.constant 0 : index
      %c0_27 = arith.constant 0 : index
      %18 = vector.load %arg9[%c0_25, %c0_26, %c0_27] : memref<1x4x128xf32, #tpu.memory_space<vmem>>, vector<1x4x128xf32>
      %cst = arith.constant dense<0.000000e+00> : vector<1x4xf32>
      %19 = vector.multi_reduction <add>, %18, %cst [2] : vector<1x4x128xf32> to vector<1x4xf32>
      %cst_28 = arith.constant 3.906250e-03 : f32
      %20 = vector.broadcast %cst_28 : f32 to vector<1x4xf32>
      %21 = arith.mulf %19, %20 : vector<1x4xf32>
      %c0_29 = arith.constant 0 : index
      %c0_30 = arith.constant 0 : index
      %c0_31 = arith.constant 0 : index
      %22 = vector.load %arg10[%c0_29, %c0_30, %c0_31] : memref<1x4x128xf32, #tpu.memory_space<vmem>>, vector<1x4x128xf32>
      %cst_32 = arith.constant dense<0.000000e+00> : vector<1x4xf32>
      %23 = vector.multi_reduction <add>, %22, %cst_32 [2] : vector<1x4x128xf32> to vector<1x4xf32>
      %cst_33 = arith.constant 3.906250e-03 : f32
      %24 = vector.broadcast %cst_33 : f32 to vector<1x4xf32>
      %25 = arith.mulf %23, %24 : vector<1x4xf32>
      %c0_34 = arith.constant 0 : index
      %c0_35 = arith.constant 0 : index
      %26 = vector.load %arg4[%c0_34, %c0_35] : memref<4x8xf32, #tpu.memory_space<vmem>>, vector<4x8xf32>
      %cst_36 = arith.constant dense<0.000000e+00> : vector<1x8xf32>
      %27 = tpu.matmul %21, %26, %cst_36 {dimension_numbers = #tpu.dot_dimension_numbers<[1], [0], [0], [1], [0, 0, 1, 1], [], []>} : vector<1x4xf32>, vector<4x8xf32>, vector<1x8xf32> -> vector<1x8xf32>
      %c0_37 = arith.constant 0 : index
      %c0_38 = arith.constant 0 : index
      %28 = vector.load %arg5[%c0_37, %c0_38] : memref<4x8xf32, #tpu.memory_space<vmem>>, vector<4x8xf32>
      %cst_39 = arith.constant dense<0.000000e+00> : vector<1x8xf32>
      %29 = tpu.matmul %25, %28, %cst_39 {dimension_numbers = #tpu.dot_dimension_numbers<[1], [0], [0], [1], [0, 0, 1, 1], [], []>} : vector<1x4xf32>, vector<4x8xf32>, vector<1x8xf32> -> vector<1x8xf32>
      %30 = arith.addf %27, %29 : vector<1x8xf32>
      %cst_40 = arith.constant 0.000000e+00 : f32
      %31 = vector.broadcast %cst_40 : f32 to vector<1x8xf32>
      %32 = arith.maximumf %30, %31 : vector<1x8xf32>
      %c0_41 = arith.constant 0 : index
      %c0_42 = arith.constant 0 : index
      %33 = vector.load %arg6[%c0_41, %c0_42] : memref<8x4xf32, #tpu.memory_space<vmem>>, vector<8x4xf32>
      %cst_43 = arith.constant dense<0.000000e+00> : vector<1x4xf32>
      %34 = tpu.matmul %32, %33, %cst_43 {dimension_numbers = #tpu.dot_dimension_numbers<[1], [0], [0], [1], [0, 0, 1, 1], [], []>} : vector<1x8xf32>, vector<8x4xf32>, vector<1x4xf32> -> vector<1x4xf32>
      %c0_44 = arith.constant 0 : index
      %c0_45 = arith.constant 0 : index
      %35 = vector.load %arg7[%c0_44, %c0_45] : memref<1x4xf32, #tpu.memory_space<vmem>>, vector<1x4xf32>
      %36 = arith.addf %34, %35 : vector<1x4xf32>
      %37 = math.absf %36 : vector<1x4xf32>
      %cst_46 = arith.constant 0.000000e+00 : f32
      %38 = vector.broadcast %cst_46 : f32 to vector<1x4xf32>
      %39 = arith.subf %38, %37 : vector<1x4xf32>
      %40 = math.exp %39 : vector<1x4xf32>
      %cst_47 = arith.constant 0.000000e+00 : f32
      %41 = vector.broadcast %cst_47 : f32 to vector<1x4xf32>
      %42 = arith.cmpf oge, %36, %41 : vector<1x4xf32>
      %cst_48 = arith.constant 1.000000e+00 : f32
      %43 = vector.broadcast %cst_48 : f32 to vector<1x4xf32>
      %44 = arith.select %42, %43, %40 : vector<1x4xi1>, vector<1x4xf32>
      %cst_49 = arith.constant 1.000000e+00 : f32
      %45 = vector.broadcast %cst_49 : f32 to vector<1x4xf32>
      %46 = arith.addf %45, %40 : vector<1x4xf32>
      %47 = arith.divf %44, %46 : vector<1x4xf32>
      %48 = vector.shape_cast %47 : vector<1x4xf32> to vector<1x1x4xf32>
      %c0_50 = arith.constant 0 : index
      %c0_51 = arith.constant 0 : index
      %c0_52 = arith.constant 0 : index
      %49 = vector.load %arg8[%c0_50, %c0_51, %c0_52] : memref<1x1x4xf32, #tpu.memory_space<vmem>>, vector<1x1x4xf32>
      tpu.vector_store %arg8[%c0_50, %c0_51, %c0_52], %48 {strides = array<i32>} : memref<1x1x4xf32, #tpu.memory_space<vmem>>, vector<1x1x4xf32>,
    } else {
    }
    return
  }
  func.func @transform_0(%arg0: i32, %arg1: i32) -> (i32, i32, i32) {
    %c0_i32 = arith.constant 0 : i32
    %c0_i32_0 = arith.constant 0 : i32
    return %arg0, %c0_i32, %arg1 : i32, i32, i32
  }
  func.func @transform_1(%arg0: i32, %arg1: i32) -> (i32, i32, i32) {
    %c0_i32 = arith.constant 0 : i32
    %c0_i32_0 = arith.constant 0 : i32
    return %arg0, %c0_i32, %arg1 : i32, i32, i32
  }
  func.func @transform_2(%arg0: i32, %arg1: i32) -> (i32, i32) {
    %c0_i32 = arith.constant 0 : i32
    %c0_i32_0 = arith.constant 0 : i32
    %c0_i32_1 = arith.constant 0 : i32
    return %c0_i32, %c0_i32_0 : i32, i32
  }
  func.func @transform_3(%arg0: i32, %arg1: i32) -> (i32, i32) {
    %c0_i32 = arith.constant 0 : i32
    %c0_i32_0 = arith.constant 0 : i32
    %c0_i32_1 = arith.constant 0 : i32
    return %c0_i32, %c0_i32_0 : i32, i32
  }
  func.func @transform_4(%arg0: i32, %arg1: i32) -> (i32, i32) {
    %c0_i32 = arith.constant 0 : i32
    %c0_i32_0 = arith.constant 0 : i32
    %c0_i32_1 = arith.constant 0 : i32
    return %c0_i32, %c0_i32_0 : i32, i32
  }
  func.func @transform_5(%arg0: i32, %arg1: i32) -> (i32, i32) {
    %c0_i32 = arith.constant 0 : i32
    %c0_i32_0 = arith.constant 0 : i32
    %c0_i32_1 = arith.constant 0 : i32
    return %c0_i32, %c0_i32_0 : i32, i32
  }
  func.func @transform_6(%arg0: i32, %arg1: i32) -> (i32, i32, i32) {
    %c0_i32 = arith.constant 0 : i32
    %c0_i32_0 = arith.constant 0 : i32
    %c0_i32_1 = arith.constant 0 : i32
    return %arg0, %c0_i32, %c0_i32_0 : i32, i32, i32
  }
}

</mosaic_0001>

<bundles_post_ra>
// kernel: tpu_custom_call.1
= control target key start
LH: loop header
LB: loop body
LE: loop exit
PB: predicated region body
PF: predicated region fallthrough
CT: control target
= control target key end

     0   :  { %s1275_s0 = inlined_call_operand.hbm [shape: f32[2,4,256], index: 0, kind: input, shape index: {}]   ;;  %s1276_s1 = inlined_call_operand.hbm [shape: f32[2,4,256], index: 1, kind: input, shape index: {}]   ;;  %s1277_s2 = inlined_call_operand.vmem [shape: f32[4,8], index: 2, kind: input, shape index: {}]   ;;  %s1278_s3 = inlined_call_operand.vmem [shape: f32[4,8], index: 3, kind: input, shape index: {}]   ;;  %s1279_s4 = inlined_call_operand.vmem [shape: f32[8,4], index: 4, kind: input, shape index: {}]   ;;  %s1280_s5 = inlined_call_operand.vmem [shape: f32[1,4], index: 5, kind: input, shape index: {}]   ;;  %s1281_s6 = inlined_call_operand.hbm [shape: f32[2,1,4], index: 6, kind: output, shape index: {}]  }
   0x1   :  { %1285 = sst [smem:[#allocation13_spill]] %s1275_s0 }
   0x2   :  { %11 = vsyncpa [#allocation5], 0 }
   0x3   :  { %13 = vsyncpa [#allocation5 + $0x1], 0 }
   0x4   :  { %14 = vsyncpa [#allocation8], 0 }
   0x5   :  { %16 = vsyncpa [#allocation8 + $0x1], 0 }
   0x6   :  { %17 = vsyncpa [#allocation6], 0 }
   0x7   :  { %19 = vsyncpa [#allocation6 + $0x1], 0  ;;  %s1035_s21 = smov 0   ;;  %s1037_s22 = smov 0  }
   0x8   :  { %s1039_s23 = smov 0   ;;  %s1041_s24 = smov 0  }
   0x9   :  { %s1043_s25 = smov 0   ;;  %s1045_s26 = smov 0  }
   0xa LB: > { %s728_s27 = sadd.s32 4294967295, %s993_s26   ;;  %s729_s28 = sadd.s32 4294967294, %s993_s26   ;;  %s993_s26 = sphi %s1045_s26, %s25_s26   ;;  %s989_s25 = sphi %s1043_s25, %s1305_s25   ;;  %s985_s24 = sphi %s1041_s24, %s1304_s24   ;;  %s981_s23 = sphi %s1039_s23, %s1303_s23   ;;  %s977_s22 = sphi %s1037_s22, %s1302_s22   ;;  %s973_s21 = sphi %s1035_s21, %s1301_s21  }
   0xb   : > { %s37_s29 = sadd.s32 1, %s989_s25  ;;  %s46_s30 = sadd.s32 1, %s981_s23 }
   0xc   : > { %p39_p0 = scmp.ge.s32.totalorder %s37_s29, 2  ;;  %p53_p1 = scmp.ne.s32.totalorder %s981_s23, %s977_s22 }
   0xd   : > { %p54_p2 = scmp.eq.s32.totalorder %s993_s26, 0  ;;  %p59_p3 = scmp.ne.s32.totalorder %s977_s22, %s973_s21 }
   0xe   : > { %s1307_s29 = smov (%p39_p0, %s37_s29), 0  ;;  %p60_p5 = scmp.eq.s32.totalorder %s728_s27, 0 }
   0xf   : > { %p1076_p4 = por %p54_p2, %p53_p1  ;;  %s41_s8 = ssub.s32 %s989_s25, %s1307_s29 }
  0x10   : > { %p195_p6 = scmp.eq.s32.totalorder %s728_s27, 1  ;;  %p44_p7 = scmp.eq.s32.totalorder %s41_s8, 0 }
  0x11   : > { %p1082_p8 = por %p60_p5, %p59_p3  ;;  %p201_p10 = scmp.eq.s32.totalorder %s729_s28, 1 }
  0x12   : > { %p1086_p9 = por %p195_p6, %p53_p1  ;;  %p791_p13 = scmp.lt.s32.totalorder %s993_s26, 2 }
  0x13   : > { %s1287_s9 = scalar_select %p1082_p8, 1, 0 }
  0x14   : > { %s1288_s10 = scalar_select %p1086_p9, 1, 0 }
  0x15   : > { %s1091_s11 = scalar_select %p44_p7, %s981_s23, %s46_s30  }
  0x16   : > { %p1093_p11 = por %p201_p10, %p59_p3  ;;  %s1100_s13 = sand.u32 1, %s981_s23  }
  0x17   : > { %s1282_s14 = sshll.u32 %s1100_s13, 3  ;;  %s749_s15 = sshll.u32 %s989_s25, 7 }
  0x18   : > { %s1289_s12 = scalar_select %p1093_p11, 1, 0 }
  0x19   : > { %s1290_s0 = sld [smem:[#allocation13_spill]]  ;;  %s237_s19 = scalar_lea.vmem [#allocation4], %s1282_s14 }
  0x1a   : > { %s247_s20 = sshll.u32 %s237_s19, 4  ;;  %p1117_p0 = pnand %p791_p13, %p1076_p4  ;;  %s1113_s20 = int_to_ptr.vmem [resolvable:$true] %s247_s20 }
  0x1b   : > { %s234_s28 = scalar_lea.sflag [#allocation5], %s1100_s13 }
  0x1c   : > { %p849_p5 = pneg %p1117_p0 }
  0x1f   : > { %s1109_s18 = scalar_lea.hbm %s1290_s0, %s749_s15  ;;  %s852_s7 = scalar_lea.hbm %s1290_s0, 256 }
  0x20   : > { %s847_s30 = scalar_lea.hbm %s1109_s18, 128  ;;  %p853_p4 = scmp.lt.u32.totalorder %s1109_s18, %s1290_s0 }
  0x21   : > { %p848_p3 = scmp.ne.s32.totalorder %s1109_s18, %s847_s30  ;;  %p854_p10 = scmp.lt.u32.totalorder %s852_s7, %s847_s30 }
  0x22   : > { %p856_p12 = scmp.lt.u32.totalorder %s847_s30, %s1109_s18 }
  0x23   : > { %p850_p6 = pnand %p849_p5, %p848_p3  ;;  %p855_p13 = por %p854_p10, %p853_p4 }
  0x25   : > { %p851_p7 = pneg %p850_p6  ;;  %p857_p1 = por %p856_p12, %p855_p13 }
  0x27   : > { %p858_p2 = pnand %p857_p1, %p851_p7 }
  0x29   : > { %861 = shalt.err (!%p858_p2)
}
  0x2a   : > { %s862_s14 = scalar_lea.vmem %s1113_s20, 128  ;;  %s995_s8 = smov [#allocation4]  }
  0x2b   : > { %p863_p3 = scmp.ne.s32.totalorder %s1113_s20, %s862_s14  ;;  %s867_s16 = sshll.u32 %s995_s8, 4  ;;  %s868_s16 = int_to_ptr.vmem [resolvable:$false] %s867_s16 }
  0x2c   : > { %s869_s17 = scalar_lea.vmem %s868_s16, 256  ;;  %p870_p9 = scmp.lt.s32.totalorder %s1113_s20, %s868_s16 }
  0x2d   : > { %p865_p6 = pnand %p863_p3, %p849_p5  ;;  %p871_p4 = scmp.lt.s32.totalorder %s869_s17, %s862_s14 }
  0x2f   : > { %p866_p11 = pneg %p865_p6  ;;  %p872_p10 = por %p871_p4, %p870_p9 }
  0x31   : > { %p873_p12 = pnand %p872_p10, %p866_p11 }
  0x33   : > { %876 = shalt.err (!%p873_p12)
}
  0x34   : > { %783 = dma.hbm_to_vmem [thread:$0]  (!%p1117_p0), %s1109_s18, 128, %s1113_s20, %s234_s28  }
  0x35   : > { %p1292_p1 = scmp.lt.s32.totalorder %s993_s26, 3  ;;  %p1293_p2 = scmp.ge.s32.totalorder %s993_s26, 1 }
  0x36   : > { %s1162_s19 = scalar_lea.hbm %s1276_s1, %s749_s15  ;;  %s1295_s8 = sshll.u32 %s1100_s13, 3 }
  0x37   : > { %p1153_p7 = pnand %p1293_p2, %p1292_p1  ;;  %s258_s16 = scalar_lea.vmem [#allocation7], %s1295_s8 }
  0x38   : > { %s268_s17 = sshll.u32 %s258_s16, 4  ;;  %s255_s18 = scalar_lea.sflag [#allocation8], %s1100_s13  ;;  %s269_s17 = int_to_ptr.vmem [resolvable:$true] %s268_s17 }
  0x39   : > { %s1294_s30 = scalar_select %p1153_p7, 1, 0 }
  0x3a   : > { %s877_s20 = scalar_lea.hbm %s1162_s19, 128  ;;  %s882_s15 = scalar_lea.hbm %s1276_s1, 256 }
  0x3b   : > { %p878_p9 = scmp.ne.s32.totalorder %s1162_s19, %s877_s20  ;;  %p883_p3 = scmp.lt.u32.totalorder %s1162_s19, %s1276_s1 }
  0x3c   : > { %p884_p6 = scmp.lt.u32.totalorder %s882_s15, %s877_s20  ;;  %p886_p10 = scmp.lt.u32.totalorder %s877_s20, %s1162_s19 }
  0x3d   : > { %p880_p11 = pnand %p878_p9, %p849_p5 }
  0x3e   : > { %p885_p4 = por %p884_p6, %p883_p3 }
  0x3f   : > { %p881_p13 = pneg %p880_p11 }
  0x40   : > { %p887_p12 = por %p886_p10, %p885_p4 }
  0x42   : > { %p888_p1 = pnand %p887_p12, %p881_p13 }
  0x44   : > { %891 = shalt.err (!%p888_p1)
}
  0x45   : > { %s892_s13 = scalar_lea.vmem %s269_s17, 128  ;;  %s996_s8 = smov [#allocation7]  }
  0x46   : > { %p893_p2 = scmp.ne.s32.totalorder %s269_s17, %s892_s13  ;;  %s897_s0 = sshll.u32 %s996_s8, 4  ;;  %s898_s0 = int_to_ptr.vmem [resolvable:$false] %s897_s0 }
  0x47   : > { %s899_s16 = scalar_lea.vmem %s898_s0, 256  ;;  %p900_p8 = scmp.lt.s32.totalorder %s269_s17, %s898_s0 }
  0x48   : > { %p895_p9 = pnand %p893_p2, %p849_p5  ;;  %p901_p7 = scmp.lt.s32.totalorder %s899_s16, %s892_s13 }
  0x4a   : > { %p896_p11 = pneg %p895_p9  ;;  %p902_p3 = por %p901_p7, %p900_p8 }
  0x4c   : > { %p903_p6 = pnand %p902_p3, %p896_p11 }
  0x4e   : > { %906 = shalt.err (!%p903_p6)
}
  0x4f   : > { %786 = dma.hbm_to_vmem [thread:$0]  (!%p1117_p0), %s1162_s19, 128, %s269_s17, %s255_s18  }
  0x50   : > { %p1296_p13 = scmp.ne.s32.totalorder %s1294_s30, 0 }
  0x51   : > { %s1189_s20 = sand.u32 (!%p1296_p13), 1, %s977_s22   ;;  %p1297_p5 = scmp.ne.s32.totalorder (!%p1296_p13), %s1287_s9, 0 }
  0x52   : > { %277 = sbr.rel (%p1296_p13) target bundleno = 740 (0x2e4), region = 44  ;;  %s739_s28 = sshll.u32 (!%p1296_p13), %s1189_s20, 3 }
  0x53   : > { %s280_s15 = scalar_lea.sflag (!%p1296_p13), [#allocation5], %s1189_s20  ;;  %s283_s14 = scalar_lea.vmem (!%p1296_p13), [#allocation4], %s739_s28 }
  0x59   : > { %960 = dma.done.wait (%p1297_p5), %s280_s15, 128  }
  0x5a   : > { %962 = vsyncadd (%p1297_p5), %s280_s15, 4294967168  ;;  %s289_s27 = scalar_lea.sflag [#allocation8], %s1189_s20  ;;  %s292_s19 = scalar_lea.vmem [#allocation7], %s739_s28 }
  0x5b   : > { %964 = dma.done.wait (%p1297_p5), %s289_s27, 128  }
  0x5c   : > { %966 = vsyncadd (%p1297_p5), %s289_s27, 4294967168  ;;  %v997_v0 = vmov 0.0   ;;  %v339_v1 = vld [vmem:[%s292_s19] sm:$0xf]  ;;  %v340_v2 = vld [vmem:[%s292_s19 + $0x4] sm:$0xf]  ;;  %v362_v16 = vlaneseq }
  0x5d   : > { %332 = vst [vmem:[#allocation3] sm:$0xf] %v997_v0  ;;  %331 = vst [vmem:[#allocation2] sm:$0xf] %v997_v0  ;;  %757 = vmatprep.subr.mxu0 %v997_v0  ;;  %767 = vmatprep.subr.mxu1 %v997_v0  ;;  %v333_v3 = vld [vmem:[%s283_s14] sm:$0xf]  ;;  %v341_v4 = vadd.f32 %v340_v2, %v339_v1 }
  0x5e   : > { %v334_v6 = vld [vmem:[%s283_s14 + $0x4] sm:$0xf]  ;;  %vm349_vm0 = vcmask 1043456   ;;  %v360_v15 = vld [vmem:[%s1278_s3] sm:$0xf]  ;;  %vm998_vm1 = vmmov 0  }
  0x5f   : > { %v335_v8 = vadd.f32 %v334_v6, %v333_v3  ;;  %758 = vmatpush3.msk.msra.mxu0 %vm349_vm0, %v360_v15  ;;  %759 = vmatprep.mubr.msk.f32.mxu0 %vm998_vm1, %v997_v0  ;;  %v363_v17 = vand.u32 127, %v362_v16  ;;  %v365_v18 = vshrl.u32 %v362_v16, 7  ;;  %vm368_vm2 = vcmask 31744   ;;  %v359_v23 = vld [vmem:[%s1277_s2] sm:$0xf]  ;;  %s746_s16 = sshll.u32 %s985_s24, 4 }
  0x60   : > { %762 = vmatprep.subr.mxu0 %v997_v0  ;;  %769 = vmatprep.mubr.msk.f32.mxu1 %vm998_vm1, %v997_v0  ;;  %v525_v27 = vld [vmem:[%s1279_s4] sm:$0xff]  ;;  %vm527_vm3 = vcmask 64512   ;;  %s324_s28 = scalar_lea.vmem [#allocation9], %s1189_s20  ;;  %vm610_vm5 = vcmask 24576   ;;  %s1226_s19 = scalar_lea.hbm %s1281_s6, %s746_s16 }
  0x61   : > { %v366_v19 = vsub.s32 %v363_v17, %v365_v18  ;;  %768 = vmatpush3.msra.mxu1 %v525_v27  ;;  %v526_v31 = vld [vmem:[%s1280_s5] sm:$0x1]  ;;  %s625_s15 = sshll.u32 %s324_s28, 4  ;;  %s613_s9 = scalar_lea.sflag [#allocation6], %s1189_s20  ;;  %s1228_s15 = int_to_ptr.vmem [resolvable:$true] %s625_s15 }
  0x62   : > { %s907_s24 = scalar_lea.vmem %s1228_s15, 16  ;;  %p1298_p0 = scmp.ne.s32.totalorder %s1288_s10, 0 }
  0x63   : > { %p908_p8 = scmp.ne.s32.totalorder %s1228_s15, %s907_s24  ;;  %s999_s30 = smov [#allocation9]  }
  0x64   : > { %v342_v5 = vld [vmem:[#allocation3] sm:$0xf]  ;;  %v336_v7 = vld [vmem:[#allocation2] sm:$0xf]  ;;  %s911_s17 = sshll.u32 %s999_s30, 4  ;;  %s912_s17 = int_to_ptr.vmem [resolvable:$false] %s911_s17 }
  0x65   : > { %v343_v9 = vadd.f32 %v342_v5, %v341_v4  ;;  %v337_v10 = vadd.f32 %v336_v7, %v335_v8  ;;  %p909_p7 = pnand %p908_p8, %p1298_p0  ;;  %s913_s18 = scalar_lea.vmem %s912_s17, 32 }
  0x66   : > { %p914_p10 = scmp.lt.s32.totalorder %s1228_s15, %s912_s17  ;;  %p915_p12 = scmp.lt.s32.totalorder %s913_s18, %s907_s24 }
  0x67   : > { %344 = vst [vmem:[#allocation3] sm:$0xf] %v343_v9  ;;  %338 = vst [vmem:[#allocation2] sm:$0xf] %v337_v10  ;;  %p910_p4 = pneg %p909_p7 }
  0x68   : > { %p916_p1 = por %p915_p12, %p914_p10 }
  0x6a   : > { %p917_p2 = pnand %p916_p1, %p910_p4 }
  0x6e   : > { %v354_v11 = vld [vmem:[#allocation3] sm:$0xf]  ;;  %v348_v13 = vld [vmem:[#allocation2] sm:$0xf] }
  0x6f   : > { %v355_v12 = vsel %vm349_vm0, %v354_v11, 0.0  ;;  %v350_v14 = vsel %vm349_vm0, %v348_v13, 0.0 }
  0x70   : > { %356 = vadd.xlane.f32.xlu0 %v355_v12 }
  0x74   : > { %351 = vadd.xlane.f32.xlu0 %v350_v14 }
  0xfd   : > { %v357_v20 = vpop.xlane.xlu0 %356 }
  0xfe   : > { %v358_v21 = vmul.f32 0.00390625, %v357_v20 }
 0x100   : > { %v367_v22 = vrot.slane %v358_v21, %v366_v19 }
 0x101   : > { %v352_v24 = vpop.xlane.xlu0 %351 }
 0x102   : > { %760 = vmatmul.mubr.msk.f32.vlgmr.msra.gmra.mrb[0].mxu0 %vm368_vm2, %v367_v22  ;;  %v353_v25 = vmul.f32 0.00390625, %v352_v24 }
 0x103   : > { %763 = vmatpush3.msk.msra.mxu0 %vm349_vm0, %v359_v23  ;;  %764 = vmatprep.mubr.msk.f32.mxu0 %vm998_vm1, %v997_v0 }
 0x104   : > { %v448_v26 = vrot.slane %v353_v25, %v366_v19 }
 0x10a   : > { %765 = vmatmul.mubr.msk.f32.vlgmr.msra.gmra.mrb[0].mxu0 %vm368_vm2, %v448_v26 }
 0x1dd   : > { %v520_v28 = vpop.f32.mrb[0].mxu0 }
 0x1de   : > { %v524_v29 = vmax.f32 %v520_v28, 0.0  ;;  %v766_v30 = vpop.f32.mrb[1].mxu0 }
 0x1e0   : > { %770 = vmatmul.mubr.msk.f32.vlgmr.msra.gmra.mrb[0].mxu1 %vm527_vm3, %v524_v29 }
 0x2b3   : > { %v597_v32 = vpop.f32.mrb[0].mxu1 }
 0x2b4   : > { %v598_v33 = vadd.f32 %v597_v32, %v526_v31  ;;  %v771_v34 = vpop.f32.mrb[1].mxu1 }
 0x2b6   : > { %v601_v35 = vand.u32 2147483647, %v598_v33  ;;  %vm605_vm4 = vcmp.ge.f32.partialorder %v598_v33, 0.0 }
 0x2b8   : > { %v602_v36 = vsub.f32 0.0, %v601_v35 }
 0x2ba   : > { %v603_v37 = vmul.f32 1.442695, %v602_v36 }
 0x2bc   : > { %843 = vpow2.f32 %v603_v37 }
 0x2c6   : > { %v844_v38 = vpop.eup %843 }
 0x2c7   : > { %v607_v39 = vadd.f32 1.0, %v844_v38  ;;  %v606_v41 = vsel %vm605_vm4, 1.0, %v844_v38 }
 0x2c9   : > { %845 = vrcp.f32 %v607_v39 }
 0x2d3   : > { %v846_v40 = vpop.eup %845 }
 0x2d4   : > { %v609_v42 = vmul.f32 %v846_v40, %v606_v41 }
 0x2d6   : > { %611 = vst.msk [vmem:[%s324_s28] sm:$0x1] %vm610_vm5, %v609_v42 }
 0x2d7   : > { %920 = shalt.err (!%p917_p2)
}
 0x2d8   : > { %s921_s20 = scalar_lea.hbm %s1226_s19, 16  ;;  %s925_s8 = scalar_lea.hbm %s1281_s6, 32 }
 0x2d9   : > { %p922_p9 = scmp.ne.s32.totalorder %s1226_s19, %s921_s20  ;;  %p926_p6 = scmp.lt.u32.totalorder %s1226_s19, %s1281_s6 }
 0x2da   : > { %p927_p13 = scmp.lt.u32.totalorder %s925_s8, %s921_s20  ;;  %p929_p8 = scmp.lt.u32.totalorder %s921_s20, %s1226_s19 }
 0x2db   : > { %p923_p11 = pnand %p922_p9, %p1298_p0 }
 0x2dc   : > { %p928_p5 = por %p927_p13, %p926_p6 }
 0x2dd   : > { %p924_p3 = pneg %p923_p11 }
 0x2de   : > { %p930_p7 = por %p929_p8, %p928_p5 }
 0x2e0   : > { %p931_p4 = pnand %p930_p7, %p924_p3 }
 0x2e2   : > { %934 = shalt.err (!%p931_p4)
}
 0x2e3   : > { %778 = dma.vmem_to_hbm [thread:$0]  (%p1298_p0), %s1228_s15, 16, %s1226_s19, %s613_s9  }
 0x2e4 PF: > { %s637_s28 = sand.u32 1, %s973_s21   ;;  %p1299_p10 = scmp.ne.s32.totalorder %s1289_s12, 0 }
 0x2e5   : > { %p1300_p12 = scmp.ge.s32.totalorder %s993_s26, 2  ;;  %s638_s14 = scalar_lea.sflag [#allocation6], %s637_s28 }
 0x2e7   : > { %p788_p1 = pnand %p1300_p12, %p1299_p10 }
 0x2e9   : > { %968 = dma.done.wait (!%p788_p1), %s638_s14, 16  }
 0x2ea   : > { %970 = vsyncadd (!%p788_p1), %s638_s14, 4294967280  ;;  %s25_s26 = sadd.s32 1, %s993_s26   ;;  %s1301_s21 = smov %s977_s22 }
 0x2eb   : > { %p22_p2 = scmp.ge.s32.totalorder %s25_s26, 4   ;;  %s1302_s22 = smov %s981_s23 }
 0x2ec   : > { %s1303_s23 = smov %s1091_s11  ;;  %s1304_s24 = smov %s989_s25 }
 0x2ed   : > { %s1305_s25 = smov %s1307_s29  ;;  %24 = sbr.rel (!%p22_p2) target bundleno = 10 (0xa), region = 110 }
 0x2f4   :  { %642 = vsyncpa [#allocation5], 1 }
 0x2f5   :  { %644 = vsyncpa [#allocation5 + $0x1], 1 }
 0x2f6   :  { %645 = vsyncpa [#allocation8], 1 }
 0x2f7   :  { %647 = vsyncpa [#allocation8 + $0x1], 1 }
 0x2f8   :  { %648 = vsyncpa [#allocation6], 1 }
 0x2f9   :  { %650 = vsyncpa [#allocation6 + $0x1], 1 }

</bundles_post_ra>
